<compile_context>
chip_gen: v6e
topology: v6e:2x2x1
jax: 0.10.0
libtpu: 0.0.40
codegen_flags: <defaults>
</compile_context>

<pallas_src>
import math

import jax
import jax.numpy as jnp
from jax import lax
from jax.experimental import pallas as pl
from jax.experimental.pallas import tpu as pltpu

# --- model hyper-parameters (small, consistent with the module) ------------
VOCAB = 256                              # vocab_size
HIDDEN = 32                              # hidden_nodes
LAYERS = 2                               # hidden_layers
N_EMBED = math.ceil(VOCAB ** 0.25)       # = 4
BATCH, SEQ = 2, 8                        # inputs: (2, 8) int token ids

# --- packed-weight row layout ----------------------------------------------
# Narrow buffer (last dim = HIDDEN):
#   rows [0, VOCAB)            : emb @ W1 + b1            (fused embed + first_dense)
#   rows [OFF_WL + i*H, +H)    : W_hid[i//2] + W_hid[i]   (pre-summed, matches forward quirk)
#   row   OFF_BL + i           : b_hid[i//2] + b_hid[i]
OFF_WL = VOCAB
OFF_BL = VOCAB + LAYERS * HIDDEN
NARROW_ROWS = ((OFF_BL + LAYERS + 7) // 8) * 8           # pad rows to sublane multiple
# Wide buffer (last dim = VOCAB):
#   rows [0, HIDDEN) : W_out ; row HIDDEN : b_out
WIDE_ROWS = ((HIDDEN + 1 + 7) // 8) * 8


def wildcard_kernel(tok_ref, wn_ref, ww_ref, out_ref):
    # tok_ref : (TN, 1)            int32  token ids for this row tile
    # wn_ref  : (NARROW_ROWS, H)   f32    packed narrow weights (layout above)
    # ww_ref  : (WIDE_ROWS, V)     f32    packed wide weights [W_out ; b_out]
    # out_ref : (TN, V)            f32    logits
    tok = tok_ref[...]                                        # (TN, 1)
    tn = tok.shape[0]

    # One-hot over vocab; onehot @ (emb@W1 + b1) == emb[tok] @ W1 + b1 exactly,
    # because the one-hot matmul is pure row selection.
    vocab_iota = lax.broadcasted_iota(jnp.int32, (tn, VOCAB), 1)
    onehot = (vocab_iota == tok).astype(jnp.float32)          # (TN, V)

    # fused embedding + first_dense (+b1 already folded in), then ReLU.
    x = jnp.dot(onehot, wn_ref[0:VOCAB, :],
                preferred_element_type=jnp.float32)           # (TN, H)
    x = jnp.maximum(x, 0.0)

    # hidden layers: x = relu(x @ (W[i//2]+W[i]) + (b[i//2]+b[i]))
    for i in range(LAYERS):
        w = wn_ref[OFF_WL + i * HIDDEN: OFF_WL + (i + 1) * HIDDEN, :]   # (H, H)
        b = wn_ref[OFF_BL + i: OFF_BL + i + 1, :]                        # (1, H)
        x = jnp.dot(x, w, preferred_element_type=jnp.float32) + b
        x = jnp.maximum(x, 0.0)

    # output_dense: lane-dense 256-wide stores.
    out_ref[...] = (jnp.dot(x, ww_ref[0:HIDDEN, :],
                            preferred_element_type=jnp.float32)
                    + ww_ref[HIDDEN:HIDDEN + 1, :])


def fuse_params(params):
    """Wrapper-side algebraic folds + weight packing (static, done once)."""
    emb, w1, b1, wl, bl, wo, bo = params
    wef_b = emb @ w1 + b1                                     # (V, H); exact under one-hot selection
    # Pre-sum the two weights/biases used at each hidden layer (matches
    # linears[i//2](x) + linears[i](x) within f32 rounding).
    wl_f = jnp.concatenate([wl[i // 2] + wl[i] for i in range(LAYERS)], axis=0)  # (L*H, H)
    bl_f = jnp.concatenate([bl[i // 2] + bl[i] for i in range(LAYERS)], axis=0)  # (L, H)

    narrow = jnp.concatenate([wef_b, wl_f, bl_f], axis=0)     # (V + L*H + L, H)
    narrow = jnp.pad(narrow, ((0, NARROW_ROWS - narrow.shape[0]), (0, 0)))
    wide = jnp.concatenate([wo, bo], axis=0)                  # (H+1, V)
    wide = jnp.pad(wide, ((0, WIDE_ROWS - wide.shape[0]), (0, 0)))
    return narrow, wide


def wildcard_forward(tokens, fused_params, max_tile_n=512):
    """tokens: int array (batch, seq). Returns (batch, seq, VOCAB) float32."""
    narrow, wide = fused_params
    n = tokens.size
    tok_flat = tokens.reshape(n).astype(jnp.int32)

    # Row tile: multiple of 8 (f32 sublanes).  For small n take the whole thing
    # in one step (avoids pad/slice at the shipped 2x8 size); for large n use
    # 512-row tiles to amortize per-step overhead while staying tiny in VMEM.
    if n <= max_tile_n:
        tile_n = ((n + 7) // 8) * 8
    else:
        tile_n = max_tile_n
    n_pad = pl.cdiv(n, tile_n) * tile_n
    if n_pad != n:
        tok_flat = jnp.pad(tok_flat, (0, n_pad - n))          # pad rows use token id 0
    tok2d = tok_flat.reshape(n_pad, 1)
    grid = (n_pad // tile_n,)

    # Tokens/output tiled along rows; both packed weight buffers use a constant
    # index_map so they stay VMEM-resident across the whole grid.
    in_specs = [
        pl.BlockSpec((tile_n, 1), lambda i: (i, 0)),                 # tokens
        pl.BlockSpec((NARROW_ROWS, HIDDEN), lambda i: (0, 0)),       # packed narrow weights
        pl.BlockSpec((WIDE_ROWS, VOCAB), lambda i: (0, 0)),          # packed wide weights
    ]
    out_spec = pl.BlockSpec((tile_n, VOCAB), lambda i: (i, 0))

    out = pl.pallas_call(
        wildcard_kernel,
        out_shape=jax.ShapeDtypeStruct((n_pad, VOCAB), jnp.float32),
        grid=grid,
        in_specs=in_specs,
        out_specs=out_spec,
        compiler_params=pltpu.CompilerParams(
            dimension_semantics=("parallel",)),   # shards row grid across TCs when grid > 1
    )(tok2d, narrow, wide)

    if n_pad != n:
        out = out[:n]
    return out.reshape(tokens.shape + (VOCAB,))


def init_params(key):
    """Deterministic, PyTorch-style initialization (shapes from __init__)."""
    ks = jax.random.split(key, 8)

    def linear(kw, kb, fan_in, fan_out):
        bound = 1.0 / math.sqrt(fan_in)
        # stored transposed: (in, out)
        w = jax.random.uniform(kw, (fan_in, fan_out), jnp.float32,
                               -bound, bound)
        b = jax.random.uniform(kb, (1, fan_out), jnp.float32, -bound, bound)
        return w, b

    emb = jax.random.normal(ks[0], (VOCAB, N_EMBED), jnp.float32)
    w1, b1 = linear(ks[1], ks[2], N_EMBED, HIDDEN)
    wls, bls = [], []
    lkeys = jax.random.split(ks[3], 2 * LAYERS)
    for i in range(LAYERS):
        w, b = linear(lkeys[2 * i], lkeys[2 * i + 1], HIDDEN, HIDDEN)
        wls.append(w)
        bls.append(b[None])                                   # (1, 1, H)
    wl = jnp.concatenate([w[None] for w in wls], axis=0)      # (L, H, H)
    bl = jnp.concatenate(bls, axis=0)                         # (L, 1, H)
    wo, bo = linear(ks[4], ks[5], HIDDEN, VOCAB)
    return (emb, w1, b1, wl, bl, wo, bo)


def reference_forward(tokens, params):
    """Pure-JAX reference mirroring the PyTorch forward exactly (unfused)."""
    emb, w1, b1, wl, bl, wo, bo = params
    x = emb[tokens]                                           # (B, S, E)
    x = jnp.maximum(x @ w1 + b1[0], 0.0)
    for i in range(LAYERS):
        x = (x @ wl[i // 2] + bl[i // 2, 0]) + (x @ wl[i] + bl[i, 0])
        x = jnp.maximum(x, 0.0)
    return x @ wo + bo[0]


if __name__ == "__main__":
    key = jax.random.PRNGKey(0)
    kp, kt = jax.random.split(key)
    params = init_params(kp)
    fused = fuse_params(params)
    tokens = jax.random.randint(kt, (BATCH, SEQ), 0, VOCAB, dtype=jnp.int32)

    out = wildcard_forward(tokens, fused)
    out = jax.block_until_ready(out)

    ref = reference_forward(tokens, params)
    assert out.shape == (BATCH, SEQ, VOCAB)
    assert jnp.allclose(out, ref, atol=1e-4, rtol=1e-4)

    print("KERNEL_OK")
</pallas_src>

<mosaic_0001>
module attributes {stable_mosaic.version = 11 : i64} {
  func.func @wildcard_kernel(%arg0: i32, %arg1: memref<16x1xi32, #tpu.memory_space<vmem>>, %arg2: memref<328x32xf32, #tpu.memory_space<vmem>>, %arg3: memref<40x256xf32, #tpu.memory_space<vmem>>, %arg4: memref<16x256xf32, #tpu.memory_space<vmem>>) attributes {dimension_semantics = [#tpu.dimension_semantics<parallel>], iteration_bounds = array<i64: 1>, scalar_prefetch = 0 : i64, scratch_operands = 0 : i64, tpu.core_type = #tpu.core_type<tc>, window_params = [{transform_indices = @transform_0, window_bounds = array<i64: 16, 1>}, {pipeline_mode = #tpu.pipeline_mode<synchronous>, transform_indices = @transform_1, window_bounds = array<i64: 328, 32>}, {pipeline_mode = #tpu.pipeline_mode<synchronous>, transform_indices = @transform_2, window_bounds = array<i64: 40, 256>}, {transform_indices = @transform_3, window_bounds = array<i64: 16, 256>}]} {
    %c0 = arith.constant 0 : index
    %c0_0 = arith.constant 0 : index
    %0 = vector.load %arg1[%c0, %c0_0] : memref<16x1xi32, #tpu.memory_space<vmem>>, vector<16x1xi32>
    %1 = tpu.iota {dimensions = array<i32: 1>} : vector<16x256xi32>
    %2 = vector.broadcast %0 : vector<16x1xi32> to vector<16x256xi32>
    %3 = arith.cmpi eq, %1, %2 : vector<16x256xi32>
    %4 = arith.extui %3 : vector<16x256xi1> to vector<16x256xi32>
    %5 = arith.sitofp %4 : vector<16x256xi32> to vector<16x256xf32>
    %c0_1 = arith.constant 0 : index
    %c0_2 = arith.constant 0 : index
    %6 = vector.load %arg2[%c0_1, %c0_2] : memref<328x32xf32, #tpu.memory_space<vmem>>, vector<256x32xf32>
    %cst = arith.constant dense<0.000000e+00> : vector<16x32xf32>
    %7 = tpu.matmul %5, %6, %cst {dimension_numbers = #tpu.dot_dimension_numbers<[1], [0], [0], [1], [0, 0, 1, 1], [], []>} : vector<16x256xf32>, vector<256x32xf32>, vector<16x32xf32> -> vector<16x32xf32>
    %cst_3 = arith.constant 0.000000e+00 : f32
    %8 = vector.broadcast %cst_3 : f32 to vector<16x32xf32>
    %9 = arith.maximumf %7, %8 : vector<16x32xf32>
    %c256 = arith.constant 256 : index
    %c0_4 = arith.constant 0 : index
    %10 = vector.load %arg2[%c256, %c0_4] : memref<328x32xf32, #tpu.memory_space<vmem>>, vector<32x32xf32>
    %c320 = arith.constant 320 : index
    %c0_5 = arith.constant 0 : index
    %11 = vector.load %arg2[%c320, %c0_5] : memref<328x32xf32, #tpu.memory_space<vmem>>, vector<1x32xf32>
    %cst_6 = arith.constant dense<0.000000e+00> : vector<16x32xf32>
    %12 = tpu.matmul %9, %10, %cst_6 {dimension_numbers = #tpu.dot_dimension_numbers<[1], [0], [0], [1], [0, 0, 1, 1], [], []>} : vector<16x32xf32>, vector<32x32xf32>, vector<16x32xf32> -> vector<16x32xf32>
    %13 = vector.broadcast %11 : vector<1x32xf32> to vector<16x32xf32>
    %14 = arith.addf %12, %13 : vector<16x32xf32>
    %cst_7 = arith.constant 0.000000e+00 : f32
    %15 = vector.broadcast %cst_7 : f32 to vector<16x32xf32>
    %16 = arith.maximumf %14, %15 : vector<16x32xf32>
    %c288 = arith.constant 288 : index
    %c0_8 = arith.constant 0 : index
    %17 = vector.load %arg2[%c288, %c0_8] : memref<328x32xf32, #tpu.memory_space<vmem>>, vector<32x32xf32>
    %c321 = arith.constant 321 : index
    %c0_9 = arith.constant 0 : index
    %18 = vector.load %arg2[%c321, %c0_9] : memref<328x32xf32, #tpu.memory_space<vmem>>, vector<1x32xf32>
    %cst_10 = arith.constant dense<0.000000e+00> : vector<16x32xf32>
    %19 = tpu.matmul %16, %17, %cst_10 {dimension_numbers = #tpu.dot_dimension_numbers<[1], [0], [0], [1], [0, 0, 1, 1], [], []>} : vector<16x32xf32>, vector<32x32xf32>, vector<16x32xf32> -> vector<16x32xf32>
    %20 = vector.broadcast %18 : vector<1x32xf32> to vector<16x32xf32>
    %21 = arith.addf %19, %20 : vector<16x32xf32>
    %cst_11 = arith.constant 0.000000e+00 : f32
    %22 = vector.broadcast %cst_11 : f32 to vector<16x32xf32>
    %23 = arith.maximumf %21, %22 : vector<16x32xf32>
    %c0_12 = arith.constant 0 : index
    %c0_13 = arith.constant 0 : index
    %24 = vector.load %arg3[%c0_12, %c0_13] : memref<40x256xf32, #tpu.memory_space<vmem>>, vector<32x256xf32>
    %cst_14 = arith.constant dense<0.000000e+00> : vector<16x256xf32>
    %25 = tpu.matmul %23, %24, %cst_14 {dimension_numbers = #tpu.dot_dimension_numbers<[1], [0], [0], [1], [0, 0, 1, 1], [], []>} : vector<16x32xf32>, vector<32x256xf32>, vector<16x256xf32> -> vector<16x256xf32>
    %c32 = arith.constant 32 : index
    %c0_15 = arith.constant 0 : index
    %26 = vector.load %arg3[%c32, %c0_15] : memref<40x256xf32, #tpu.memory_space<vmem>>, vector<1x256xf32>
    %27 = vector.broadcast %26 : vector<1x256xf32> to vector<16x256xf32>
    %28 = arith.addf %25, %27 : vector<16x256xf32>
    %c0_16 = arith.constant 0 : index
    %c0_17 = arith.constant 0 : index
    %29 = vector.load %arg4[%c0_16, %c0_17] : memref<16x256xf32, #tpu.memory_space<vmem>>, vector<16x256xf32>
    tpu.vector_store %arg4[%c0_16, %c0_17], %28 {strides = array<i32>} : memref<16x256xf32, #tpu.memory_space<vmem>>, vector<16x256xf32>,
    return
  }
  func.func @transform_0(%arg0: i32) -> (i32, i32) {
    %c0_i32 = arith.constant 0 : i32
    %c0_i32_0 = arith.constant 0 : i32
    return %arg0, %c0_i32 : i32, i32
  }
  func.func @transform_1(%arg0: i32) -> (i32, i32) {
    %c0_i32 = arith.constant 0 : i32
    %c0_i32_0 = arith.constant 0 : i32
    %c0_i32_1 = arith.constant 0 : i32
    return %c0_i32, %c0_i32_0 : i32, i32
  }
  func.func @transform_2(%arg0: i32) -> (i32, i32) {
    %c0_i32 = arith.constant 0 : i32
    %c0_i32_0 = arith.constant 0 : i32
    %c0_i32_1 = arith.constant 0 : i32
    return %c0_i32, %c0_i32_0 : i32, i32
  }
  func.func @transform_3(%arg0: i32) -> (i32, i32) {
    %c0_i32 = arith.constant 0 : i32
    %c0_i32_0 = arith.constant 0 : i32
    return %arg0, %c0_i32 : i32, i32
  }
}

</mosaic_0001>

<bundles_post_ra>
// kernel: tpu_custom_call.1
= control target key start
LH: loop header
LB: loop body
LE: loop exit
PB: predicated region body
PF: predicated region fallthrough
CT: control target
= control target key end

     0   :  { %v574_v2 = vmov 0   ;;  %s770_s0 = inlined_call_operand.vmem [shape: s32[16,1], index: 0, kind: input, shape index: {}]   ;;  %s771_s1 = inlined_call_operand.vmem [shape: f32[328,32], index: 1, kind: input, shape index: {}]   ;;  %s772_s2 = inlined_call_operand.vmem [shape: f32[40,256], index: 2, kind: input, shape index: {}]   ;;  %s773_s3 = inlined_call_operand.hbm [shape: f32[16,256], index: 3, kind: output, shape index: {}]  }
   0x1   :  { %v15_v0 = vld [vmem:[%s770_s0] sm:$0xff]  ;;  %v69_v1 = vld [vmem:[%s771_s1 + $0xf8] sm:$0xff]  ;;  %551 = vset.pattern.permute.xlu0 %v574_v2  ;;  %v68_v4 = vld [vmem:[%s771_s1 + $0xf0] sm:$0xff] }
   0x2   :  { %473 = vmatprep.subr.mxu0 %v69_v1  ;;  %v53_v3 = vld [vmem:[%s771_s1 + $0x78] sm:$0xff]  ;;  %v52_v5 = vld [vmem:[%s771_s1 + $0x70] sm:$0xff]  ;;  %21 = vperm.xlu0 %551, %v15_v0   ;;  %v67_v6 = vld [vmem:[%s771_s1 + $0xe8] sm:$0xff] }
   0x3   :  { %474 = vmatpush3.msra.mxu0 %v53_v3  ;;  %v16_v7 = vld [vmem:[%s770_s0 + $0x8] sm:$0xff]  ;;  %v66_v9 = vld [vmem:[%s771_s1 + $0xe0] sm:$0xff]  ;;  %v65_v11 = vld [vmem:[%s771_s1 + $0xd8] sm:$0xff] }
   0x4   :  { %475 = vmatprep.subr.mxu0 %v68_v4  ;;  %v51_v8 = vld [vmem:[%s771_s1 + $0x68] sm:$0xff]  ;;  %v50_v10 = vld [vmem:[%s771_s1 + $0x60] sm:$0xff]  ;;  %v49_v12 = vld [vmem:[%s771_s1 + $0x58] sm:$0xff] }
   0x5   :  { %476 = vmatpush3.msra.mxu0 %v52_v5  ;;  %v64_v13 = vld [vmem:[%s771_s1 + $0xd0] sm:$0xff]  ;;  %v63_v15 = vld [vmem:[%s771_s1 + $0xc8] sm:$0xff] }
   0x6   :  { %477 = vmatprep.subr.mxu0 %v67_v6  ;;  %24 = vperm.xlu0 %551, %v16_v7   ;;  %v48_v14 = vld [vmem:[%s771_s1 + $0x50] sm:$0xff]  ;;  %v47_v16 = vld [vmem:[%s771_s1 + $0x48] sm:$0xff] }
   0x7   :  { %478 = vmatpush3.msra.mxu0 %v51_v8 }
   0x8   :  { %479 = vmatprep.subr.mxu0 %v66_v9 }
   0x9   :  { %480 = vmatpush3.msra.mxu0 %v50_v10 }
   0xa   :  { %481 = vmatprep.subr.mxu0 %v65_v11 }
   0xb   :  { %482 = vmatpush3.msra.mxu0 %v49_v12 }
   0xc   :  { %483 = vmatprep.subr.mxu0 %v64_v13 }
   0xd   :  { %8 = vsyncpa [#allocation3], 0  ;;  %484 = vmatpush3.msra.mxu0 %v48_v14  ;;  %v62_v17 = vld [vmem:[%s771_s1 + $0xc0] sm:$0xff]  ;;  %v61_v19 = vld [vmem:[%s771_s1 + $0xb8] sm:$0xff]  ;;  %v17_v35 = vlaneseq  ;;  %v575_v39 = vmov 1.0   ;;  %vm156_vm4 = vcmask 261120  }
   0xe   :  { %485 = vmatprep.subr.mxu0 %v63_v15  ;;  %v46_v18 = vld [vmem:[%s771_s1 + $0x40] sm:$0xff]  ;;  %v45_v20 = vld [vmem:[%s771_s1 + $0x38] sm:$0xff]  ;;  %v60_v21 = vld [vmem:[%s771_s1 + $0xb0] sm:$0xff]  ;;  %v576_v8 = vmov 0.0  }
   0xf   :  { %486 = vmatpush3.msra.mxu0 %v47_v16  ;;  %v44_v22 = vld [vmem:[%s771_s1 + $0x30] sm:$0xff]  ;;  %v59_v23 = vld [vmem:[%s771_s1 + $0xa8] sm:$0xff]  ;;  %v58_v25 = vld [vmem:[%s771_s1 + $0xa0] sm:$0xff]  ;;  %v18_v36 = vand.u32 127, %v17_v35  ;;  %v344_v16 = vshrl.u32 %v17_v35, 7 }
  0x10   :  { %487 = vmatprep.subr.mxu0 %v62_v17  ;;  %v43_v24 = vld [vmem:[%s771_s1 + $0x28] sm:$0xff]  ;;  %v42_v26 = vld [vmem:[%s771_s1 + $0x20] sm:$0xff]  ;;  %v57_v27 = vld [vmem:[%s771_s1 + $0x98] sm:$0xff] }
  0x11   :  { %488 = vmatpush3.msra.mxu0 %v46_v18  ;;  %v41_v28 = vld [vmem:[%s771_s1 + $0x18] sm:$0xff]  ;;  %v56_v29 = vld [vmem:[%s771_s1 + $0x90] sm:$0xff]  ;;  %v55_v31 = vld [vmem:[%s771_s1 + $0x88] sm:$0xff]  ;;  %v19_v37 = vadd.s32 128, %v18_v36  ;;  %v345_v17 = vsub.s32 0, %v344_v16 }
  0x12   :  { %489 = vmatprep.subr.mxu0 %v61_v19  ;;  %v40_v30 = vld [vmem:[%s771_s1 + $0x10] sm:$0xff]  ;;  %v39_v32 = vld [vmem:[%s771_s1 + $0x8] sm:$0xff]  ;;  %v54_v33 = vld [vmem:[%s771_s1 + $0x80] sm:$0xff]  ;;  %v349_v19 = vsub.s32 1, %v344_v16 }
  0x13   :  { %490 = vmatpush3.msra.mxu0 %v45_v20  ;;  %v38_v34 = vld [vmem:[%s771_s1] sm:$0xff]  ;;  %v150_v41 = vld [vmem:[%s771_s1 + $0x118] sm:$0xff]  ;;  %v149_v42 = vld [vmem:[%s771_s1 + $0x110] sm:$0xff] }
  0x14   :  { %491 = vmatprep.subr.mxu0 %v60_v21  ;;  %523 = vmatprep.subr.mxu1 %v150_v41  ;;  %v148_v43 = vld [vmem:[%s771_s1 + $0x108] sm:$0xff]  ;;  %v147_v44 = vld [vmem:[%s771_s1 + $0x100] sm:$0xff]  ;;  %v243_v53 = vld [vmem:[%s771_s1 + $0x138] sm:$0xff] }
  0x15   :  { %492 = vmatpush3.msra.mxu0 %v44_v22  ;;  %524 = vmatpush3.msra.mxu1 %v150_v41  ;;  %v242_v54 = vld [vmem:[%s771_s1 + $0x130] sm:$0xff]  ;;  %v241_v55 = vld [vmem:[%s771_s1 + $0x128] sm:$0xff]  ;;  %v240_v56 = vld [vmem:[%s771_s1 + $0x120] sm:$0xff] }
  0x16   :  { %493 = vmatprep.subr.mxu0 %v59_v23  ;;  %525 = vmatprep.subr.mxu1 %v149_v42  ;;  %v339_v57 = vld [vmem:[%s772_s2 + $0x38] sm:$0xff]  ;;  %v464_v58 = vld [vmem:[%s771_s1 + $0x140] ss:$0 sm:$0xff]  ;;  %v338_v1 = vld [vmem:[%s772_s2 + $0x30] sm:$0xff] }
  0x17   :  { %494 = vmatpush3.msra.mxu0 %v43_v24  ;;  %526 = vmatpush3.msra.mxu1 %v149_v42  ;;  %v337_v2 = vld [vmem:[%s772_s2 + $0x28] sm:$0xff]  ;;  %v336_v3 = vld [vmem:[%s772_s2 + $0x20] sm:$0xff]  ;;  %v335_v4 = vld [vmem:[%s772_s2 + $0x18] sm:$0xff] }
  0x18   :  { %495 = vmatprep.subr.mxu0 %v58_v25  ;;  %527 = vmatprep.subr.mxu1 %v148_v43  ;;  %v334_v5 = vld [vmem:[%s772_s2 + $0x10] sm:$0xff]  ;;  %v333_v6 = vld [vmem:[%s772_s2 + $0x8] sm:$0xff]  ;;  %v332_v7 = vld [vmem:[%s772_s2] sm:$0xff] }
  0x19   :  { %496 = vmatpush3.msra.mxu0 %v42_v26  ;;  %528 = vmatpush3.msra.mxu1 %v148_v43  ;;  %v467_v10 = vld [vmem:[%s771_s1 + $0x141] ss:$0 sm:$0xff]  ;;  %v470_v18 = vld [vmem:[%s772_s2 + $0x40] ss:$8 sm:$0x3]  ;;  %s577_s1 = smov [#allocation2]  }
  0x1a   :  { %497 = vmatprep.subr.mxu0 %v57_v27  ;;  %529 = vmatprep.subr.mxu1 %v147_v44  ;;  %v346_v20 = vrot.slane %v470_v18, %v345_v17  ;;  %v350_v21 = vrot.slane %v470_v18, %v349_v19  ;;  %s445_s0 = sshll.u32 %s577_s1, 4  ;;  %s446_s0 = int_to_ptr.vmem [resolvable:$true] %s445_s0 }
  0x1b   :  { %498 = vmatpush3.msra.mxu0 %v41_v28  ;;  %530 = vmatpush3.msra.mxu1 %v147_v44  ;;  %s552_s7 = scalar_lea.vmem %s446_s0, 512  ;;  %p557_p1 = scmp.lt.s32.totalorder %s446_s0, %s446_s0 }
  0x1c   :  { %499 = vmatprep.subr.mxu0 %v56_v29  ;;  %534 = vmatprep.subr.mxu1 %v243_v53  ;;  %p553_p0 = scmp.ne.s32.totalorder %s446_s0, %s552_s7  ;;  %p558_p2 = scmp.lt.s32.totalorder %s552_s7, %s552_s7 }
  0x1d   :  { %500 = vmatpush3.msra.mxu0 %v40_v30 }
  0x1e   :  { %501 = vmatprep.subr.mxu0 %v55_v31  ;;  %p559_p3 = por %p558_p2, %p557_p1 }
  0x1f   :  { %502 = vmatpush3.msra.mxu0 %v39_v32 }
  0x20   :  { %503 = vmatprep.subr.mxu0 %v54_v33  ;;  %p560_p4 = pnand %p559_p3, %p553_p0 }
  0x21   :  { %504 = vmatpush3.msra.mxu0 %v38_v34 }
  0x7d   :  { %v22_v38 = vpop.permute.xlu0 %21 }
  0x7e   :  { %vm26_vm0 = vcmp.eq.s32.totalorder %v18_v36, %v22_v38  ;;  %vm27_vm1 = vcmp.eq.s32.totalorder %v19_v37, %v22_v38 }
  0x7f   :  { %460 = vmatprep.mubr.msk.f32.mxu0 %vm27_vm1, %v575_v39 }
  0x80   :  { %461 = vmatmul.mubr.msk.f32.vlgmr.msra.gmra.mxu0 %vm26_vm0, %v575_v39 }
  0x81   :  { %v25_v40 = vpop.permute.xlu0 %24 }
  0x82   :  { %vm28_vm2 = vcmp.eq.s32.totalorder %v18_v36, %v25_v40  ;;  %vm29_vm3 = vcmp.eq.s32.totalorder %v19_v37, %v25_v40 }
  0x83   :  { %462 = vmatprep.mubr.msk.f32.mxu0 %vm29_vm3, %v575_v39 }
  0x84   :  { %463 = vmatmul.mubr.msk.f32.gmra.mxu0 %vm28_vm2, %v575_v39 }
 0x140   :  { %v505_v45 = vpop.f32.mrf.mxu0 }
 0x142   :  { %v506_v46 = vpop.f32.mrf.mxu0 }
 0x143   :  { %v507_v47 = vadd.f32 %v506_v46, %v505_v45 }
 0x144   :  { %v508_v48 = vpop.f32.mrf.mxu0 }
 0x145   :  { %v145_v49 = vmax.f32 %v507_v47, 0.0 }
 0x146   :  { %v509_v50 = vpop.f32.mrf.mxu0 }
 0x147   :  { %v510_v51 = vadd.f32 %v509_v50, %v508_v48  ;;  %531 = vmatprep.mubr.msk.f32.mxu1 %vm156_vm4, %v145_v49 }
 0x149   :  { %v146_v52 = vmax.f32 %v510_v51, 0.0 }
 0x14b   :  { %532 = vmatmul.mubr.msk.f32.vlgmr.msra.gmra.mxu1 %vm156_vm4, %v146_v52 }
 0x14c   :  { %535 = vmatpush3.msra.mxu1 %v243_v53 }
 0x14d   :  { %536 = vmatprep.subr.mxu1 %v242_v54 }
 0x14e   :  { %537 = vmatpush3.msra.mxu1 %v242_v54 }
 0x14f   :  { %538 = vmatprep.subr.mxu1 %v241_v55 }
 0x150   :  { %539 = vmatpush3.msra.mxu1 %v241_v55 }
 0x151   :  { %540 = vmatprep.subr.mxu1 %v240_v56 }
 0x152   :  { %541 = vmatpush3.msra.mxu1 %v240_v56 }
 0x153   :  { %383 = vmatprep.subr.mxu1 %v339_v57 }
 0x20b   :  { %v533_v59 = vpop.f32.mrf.mxu1 }
 0x20c   :  { %v235_v60 = vadd.f32 %v533_v59, %v464_v58 }
 0x20d   :  { %v229_v61 = vpop.f32.mrf.mxu1 }
 0x20e   :  { %v230_v62 = vadd.f32 %v464_v58, %v229_v61  ;;  %v239_v0 = vmax.f32 %v235_v60, 0.0 }
 0x210   :  { %v238_v63 = vmax.f32 %v230_v62, 0.0 }
 0x212   :  { %542 = vmatprep.mubr.msk.f32.mxu1 %vm156_vm4, %v238_v63 }
 0x213   :  { %543 = vmatmul.mubr.msk.f32.vlgmr.msra.gmra.mxu1 %vm156_vm4, %v239_v0 }
 0x214   :  { %384 = vmatpush1.msra.mxu1 %v338_v1  ;;  %423 = vmatprep.mubr.f32.mxu1 %v576_v8 }
 0x215   :  { %385 = vmatprep.subr.mxu1 %v337_v2 }
 0x216   :  { %386 = vmatpush1.msra.mxu1 %v336_v3 }
 0x217   :  { %387 = vmatprep.subr.mxu1 %v335_v4 }
 0x218   :  { %388 = vmatpush1.msra.mxu1 %v334_v5 }
 0x219   :  { %389 = vmatprep.subr.mxu1 %v333_v6 }
 0x21a   :  { %390 = vmatpush1.msra.mxu1 %v332_v7 }
 0x2d3   :  { %v544_v9 = vpop.f32.mrf.mxu1 }
 0x2d4   :  { %v327_v13 = vadd.f32 %v544_v9, %v467_v10 }
 0x2d5   :  { %v321_v11 = vpop.f32.mrf.mxu1 }
 0x2d6   :  { %v322_v12 = vadd.f32 %v467_v10, %v321_v11  ;;  %v331_v15 = vmax.f32 %v327_v13, 0.0 }
 0x2d8   :  { %v330_v14 = vmax.f32 %v322_v12, 0.0 }
 0x2da   :  { %471 = vmatmul.mubr.msk.f32.vlgmr.msra.gmra.mxu1 %vm156_vm4, %v330_v14 }
 0x2db   :  { %429 = vmatprep.mubr.f32.mxu1 %v576_v8 }
 0x2de   :  { %472 = vmatmul.mubr.msk.f32.gmra.mxu1 %vm156_vm4, %v331_v15 }
 0x39a   :  { %v425_v22 = vpop.f32.mrf.mxu1 }
 0x39b   :  { %v426_v23 = vadd.f32 %v425_v22, %v346_v20 }
 0x39c   :  { %v427_v24 = vpop.f32.mrf.mxu1 }
 0x39d   :  { %436 = vst [vmem:[#allocation2] sm:$0xff] %v426_v23  ;;  %v428_v25 = vadd.f32 %v427_v24, %v350_v21 }
 0x39e   :  { %v431_v26 = vpop.f32.mrf.mxu1 }
 0x39f   :  { %437 = vst [vmem:[#allocation2 + $0x8] sm:$0xff] %v428_v25  ;;  %v432_v27 = vadd.f32 %v431_v26, %v346_v20 }
 0x3a0   :  { %v433_v28 = vpop.f32.mrf.mxu1 }
 0x3a1   :  { %438 = vst [vmem:[#allocation2 + $0x10] sm:$0xff] %v432_v27  ;;  %v434_v29 = vadd.f32 %v433_v28, %v350_v21 }
 0x3a3   :  { %439 = vst [vmem:[#allocation2 + $0x18] sm:$0xff] %v434_v29 }
 0x3a4   :  { %563 = shalt.err (!%p560_p4)
}
 0x3a5   :  { %s578_s2 = smov 256   ;;  %s579_s8 = smov 16  }
 0x3a6   :  { %451 = dma.vmem_to_hbm [thread:$0]  %s446_s0, 512, %s773_s3, [#allocation3], %s578_s2, %s578_s2, %s579_s8  }
 0x3a7   :  { %572 = dma.done.wait [#allocation3], 512  }
 0x3a8   :  { %573 = vsyncadd [#allocation3], 4294966784 }
 0x3a9   :  { %455 = vsyncpa [#allocation3], 1 }

</bundles_post_ra>
